<compile_context>
chip_gen: v7x
topology: tpu7x:2x2x1
jax: 0.10.0
libtpu: 0.0.40
codegen_flags: <defaults>
</compile_context>

<pallas_src>
import math
import functools

import jax
import jax.numpy as jnp
from jax.experimental import pallas as pl
from jax.experimental.pallas import tpu as pltpu


def _gather_embed_kernel(ids_ref, table_hbm, out_ref, buf, sems, *, tile_n, scale):
    # ids_ref:   (N_pad,)      int32   (SMEM, scalar prefetch)
    # table_hbm: (vocab, D)    f32     (HBM ref, no auto-DMA)
    # out_ref:   (tile_n, D)   f32     (VMEM output block)
    # buf:       (tile_n, D)   f32     (VMEM scratch, gather destination)
    # sems:      (tile_n,)     DMA semaphores
    step = pl.program_id(0)
    base = step * tile_n

    # Issue one row-gather DMA per token in this tile; all DMAs are in flight
    # simultaneously so their HBM latencies overlap.
    @pl.loop(0, tile_n)
    def _issue(t):
        row = ids_ref[base + t]
        pltpu.make_async_copy(
            table_hbm.at[pl.ds(row, 1), :],   # (1, D) row of the table in HBM
            buf.at[pl.ds(t, 1), :],           # (1, D) row of the VMEM scratch
            sems.at[t],
        ).start()

    # Wait for all gathers of this tile.
    @pl.loop(0, tile_n)
    def _wait(t):
        pltpu.make_async_copy(
            table_hbm.at[pl.ds(0, 1), :],
            buf.at[pl.ds(t, 1), :],
            sems.at[t],
        ).wait()

    # Kernel compute is just the sqrt(d_model) scale.
    out_ref[...] = (buf[...] * scale).astype(out_ref.dtype)


def input_embedding(ids, table, *, tile_n=128):
    """ids: (B, S) int -> (B, S, D) = table[ids] * sqrt(D).  table: (vocab, D)."""
    B, S = ids.shape
    vocab, D = table.shape
    scale = math.sqrt(D)
    itemsize = jnp.dtype(table.dtype).itemsize

    N = B * S
    tile_n = max(8, int(tile_n))
    N_pad = pl.cdiv(N, tile_n) * tile_n

    ids_flat = ids.reshape(N).astype(jnp.int32)
    # Clamp ids so a bad token id can never produce an out-of-bounds HBM DMA
    # (torch.nn.Embedding would raise instead; documented behavioral difference).
    ids_flat = jnp.clip(ids_flat, 0, vocab - 1)
    ids_flat = jnp.pad(ids_flat, (0, N_pad - N))   # padded tokens gather row 0, sliced off below

    kernel = functools.partial(_gather_embed_kernel, tile_n=tile_n, scale=scale)

    tile_bytes = tile_n * D * itemsize
    cost = pl.CostEstimate(
        flops=N_pad * D,                                   # the scale multiply
        transcendentals=0,
        bytes_accessed=2 * N_pad * D * itemsize + N_pad * 4,  # gather reads + output writes + ids
    )

    out_padded = pl.pallas_call(
        kernel,
        out_shape=jax.ShapeDtypeStruct((N_pad, D), table.dtype),
        grid_spec=pltpu.PrefetchScalarGridSpec(
            num_scalar_prefetch=1,                  # ids -> SMEM, visible to index_maps
            grid=(N_pad // tile_n,),
            in_specs=[
                pl.BlockSpec(memory_space=pl.ANY),  # table stays in HBM; gathered manually
            ],
            # Output block is lane-dense whenever D is a multiple of 128; for the toy
            # D=32 the block last dim equals the full array dim (valid layout).
            out_specs=pl.BlockSpec((tile_n, D), lambda i, ids: (i, 0)),
            scratch_shapes=[
                pltpu.VMEM((tile_n, D), table.dtype),
                pltpu.SemaphoreType.DMA((tile_n,)),
            ],
        ),
        compiler_params=pltpu.CompilerParams(
            dimension_semantics=("parallel",),      # v7x: shard token tiles across 2 TCs
            vmem_limit_bytes=max(8 * 1024 * 1024, 4 * tile_bytes + (1 << 20)),
        ),
        cost_estimate=cost,
    )(ids_flat, table)

    return out_padded[:N].reshape(B, S, D)


if __name__ == "__main__":
    # Small deterministic setup consistent with the module:
    #   vocab_size=64, embedding_vector_size=32, input ids of shape (batch=2, seq=8).
    vocab_size = 64
    d_model = 32
    B, S = 2, 8

    key = jax.random.PRNGKey(0)
    k_table, k_ids = jax.random.split(key)

    # torch.nn.Embedding initializes weights ~ N(0, 1); mirror that deterministically.
    table = jax.random.normal(k_table, (vocab_size, d_model), dtype=jnp.float32)
    ids = jax.random.randint(k_ids, (B, S), 0, vocab_size, dtype=jnp.int32)

    out = input_embedding(ids, table)
    out = jax.block_until_ready(out)

    # Pure-JAX reference: embedding lookup * sqrt(d_model).
    ref = table[ids] * math.sqrt(d_model)
    assert out.shape == (B, S, d_model), out.shape
    assert jnp.allclose(out, ref, atol=1e-5, rtol=1e-5), "mismatch vs reference"

    print("KERNEL_OK")
</pallas_src>

<mosaic_0001>
module attributes {stable_mosaic.version = 11 : i64} {
  func.func @_gather_embed_kernel(%arg0: i32, %arg1: memref<128xi32, #tpu.memory_space<smem>>, %arg2: memref<64x32xf32, #tpu.memory_space<any>>, %arg3: memref<128x32xf32, #tpu.memory_space<vmem>>, %arg4: memref<128x32xf32, #tpu.memory_space<vmem>>, %arg5: memref<128x!tpu.dma_semaphore, #tpu.memory_space<semaphore_mem>>) attributes {dimension_semantics = [#tpu.dimension_semantics<parallel>], iteration_bounds = array<i64: 1>, scalar_prefetch = 1 : i64, scratch_operands = 2 : i64, tpu.core_type = #tpu.core_type<tc>, window_params = [{}, {transform_indices = @transform_1, window_bounds = array<i64: 128, 32>}]} {
    %c128_i32 = arith.constant 128 : i32
    %0 = arith.muli %arg0, %c128_i32 : i32
    %c0_i32 = arith.constant 0 : i32
    %c128_i32_0 = arith.constant 128 : i32
    %1 = arith.addi %c0_i32, %c128_i32_0 : i32
    %c1_i32 = arith.constant 1 : i32
    scf.for %arg6 = %c0_i32 to %1 step %c1_i32  : i32 {
      %c1_i32_9 = arith.constant 1 : i32
      %7 = arith.muli %arg6, %c1_i32_9 : i32
      %c0_i32_10 = arith.constant 0 : i32
      %8 = arith.addi %c0_i32_10, %7 : i32
      %9 = arith.addi %0, %8 : i32
      %10 = arith.index_cast %9 : i32 to index
      %11 = memref.load %arg1[%10] : memref<128xi32, #tpu.memory_space<smem>>
      %c0_i32_11 = arith.constant 0 : i32
      %12 = tpu.memref_slice %arg2[%11, %c0_i32_11] : memref<64x32xf32, #tpu.memory_space<any>> -> memref<1x32xf32, #tpu.memory_space<any>>
      %c0_i32_12 = arith.constant 0 : i32
      %13 = tpu.memref_slice %arg4[%8, %c0_i32_12] : memref<128x32xf32, #tpu.memory_space<vmem>> -> memref<1x32xf32, #tpu.memory_space<vmem>>
      %14 = tpu.memref_slice %arg5[%8] : memref<128x!tpu.dma_semaphore, #tpu.memory_space<semaphore_mem>> -> memref<1x!tpu.dma_semaphore, #tpu.memory_space<semaphore_mem>>
      %15 = tpu.memref_squeeze %14 : memref<1x!tpu.dma_semaphore, #tpu.memory_space<semaphore_mem>> -> memref<!tpu.dma_semaphore, #tpu.memory_space<semaphore_mem>>
      tpu.enqueue_dma source(%12 : memref<1x32xf32, #tpu.memory_space<any>>) target(%13 : memref<1x32xf32, #tpu.memory_space<vmem>>) target_semaphore(%15 : memref<!tpu.dma_semaphore, #tpu.memory_space<semaphore_mem>>)
    }
    %c128_i32_1 = arith.constant 128 : i32
    %c0_i32_2 = arith.constant 0 : i32
    %c128_i32_3 = arith.constant 128 : i32
    %2 = arith.addi %c0_i32_2, %c128_i32_3 : i32
    %c1_i32_4 = arith.constant 1 : i32
    scf.for %arg6 = %c0_i32_2 to %2 step %c1_i32_4  : i32 {
      %c1_i32_9 = arith.constant 1 : i32
      %7 = arith.muli %arg6, %c1_i32_9 : i32
      %c0_i32_10 = arith.constant 0 : i32
      %8 = arith.addi %c0_i32_10, %7 : i32
      %c0_i32_11 = arith.constant 0 : i32
      %c0_i32_12 = arith.constant 0 : i32
      %9 = tpu.memref_slice %arg2[%c0_i32_11, %c0_i32_12] : memref<64x32xf32, #tpu.memory_space<any>> -> memref<1x32xf32, #tpu.memory_space<any>>
      %c0_i32_13 = arith.constant 0 : i32
      %10 = tpu.memref_slice %arg4[%8, %c0_i32_13] : memref<128x32xf32, #tpu.memory_space<vmem>> -> memref<1x32xf32, #tpu.memory_space<vmem>>
      %11 = tpu.memref_slice %arg5[%8] : memref<128x!tpu.dma_semaphore, #tpu.memory_space<semaphore_mem>> -> memref<1x!tpu.dma_semaphore, #tpu.memory_space<semaphore_mem>>
      %12 = tpu.memref_squeeze %11 : memref<1x!tpu.dma_semaphore, #tpu.memory_space<semaphore_mem>> -> memref<!tpu.dma_semaphore, #tpu.memory_space<semaphore_mem>>
      tpu.wait_dma2 semaphore(%12 : memref<!tpu.dma_semaphore, #tpu.memory_space<semaphore_mem>>) src(%9 : memref<1x32xf32, #tpu.memory_space<any>>) dst(%10 : memref<1x32xf32, #tpu.memory_space<vmem>>)
    }
    %c128_i32_5 = arith.constant 128 : i32
    %c0 = arith.constant 0 : index
    %c0_6 = arith.constant 0 : index
    %3 = vector.load %arg4[%c0, %c0_6] : memref<128x32xf32, #tpu.memory_space<vmem>>, vector<128x32xf32>
    %cst = arith.constant 5.65685415 : f32
    %4 = vector.broadcast %cst : f32 to vector<128x32xf32>
    %5 = arith.mulf %3, %4 : vector<128x32xf32>
    %c0_7 = arith.constant 0 : index
    %c0_8 = arith.constant 0 : index
    %6 = vector.load %arg3[%c0_7, %c0_8] : memref<128x32xf32, #tpu.memory_space<vmem>>, vector<128x32xf32>
    tpu.vector_store %arg3[%c0_7, %c0_8], %5 {strides = array<i32>} : memref<128x32xf32, #tpu.memory_space<vmem>>, vector<128x32xf32>,
    return
  }
  func.func @transform_1(%arg0: i32, %arg1: memref<128xi32, #tpu.memory_space<smem>>) -> (i32, i32) {
    %c0_i32 = arith.constant 0 : i32
    %c0_i32_0 = arith.constant 0 : i32
    return %arg0, %c0_i32 : i32, i32
  }
}

</mosaic_0001>

<bundles_post_ra>
// kernel: tpu_custom_call.1
= control target key start
LH: loop header
LB: loop body
LE: loop exit
PB: predicated region body
PF: predicated region fallthrough
CT: control target
= control target key end

     0   :  { %s1314_s0 = inlined_call_operand.vmem [shape: s32[128], index: 0, kind: input, shape index: {}]   ;;  %s1315_s1 = inlined_call_operand.vmem [shape: f32[64,32], index: 1, kind: input, shape index: {}]   ;;  %s1316_s2 = inlined_call_operand.vmem [shape: f32[128,32], index: 2, kind: output, shape index: {}]  }
   0x1   :  { %s7_s11 = sshll.u32 %s1314_s0, 4  ;;  %s8_s11 = int_to_ptr.vmem [resolvable:$true] %s7_s11 }
   0x2   :  { %s1196_s12 = scalar_lea.vmem %s8_s11, 16  ;;  %p1201_p1 = scmp.lt.s32.totalorder %s8_s11, %s8_s11 }
   0x3   :  { %p1197_p0 = scmp.ne.s32.totalorder %s8_s11, %s1196_s12  ;;  %p1202_p2 = scmp.lt.s32.totalorder %s1196_s12, %s1196_s12 }
   0x5   :  { %p1203_p3 = por %p1202_p2, %p1201_p1 }
   0x7   :  { %p1204_p4 = pnand %p1203_p3, %p1197_p0 }
   0x9   :  { %1207 = shalt.err (!%p1204_p4)  }
   0xa   :  { %s1228_s13 = smov [#allocation5]  }
   0xb   :  { %10 = dma.vmem_to_smem %s8_s11, 16, %s1228_s13, [#allocation4] }
   0xc   :  { %1216 = dma.done.wait [#allocation4], 16 }
   0xd   :  { %1217 = vsyncadd [#allocation4], 4294967280 }
   0xe   :  { %12 = sfence }
   0xf   :  { %s1220_s14 = smov 0  }
  0x10 LB: > { %s21_s15 = sld [smem:[#allocation5 + %s1222_s14]]  ;;  %s23_s18 = scalar_lea.vmem [#allocation2], %s1222_s14  ;;  %s1222_s14 = sphi %s1220_s14, %s19_s14  }
  0x11   : > { %s24_s19 = scalar_lea.sflag [#allocation3], %s1222_s14 }
  0x16   : > { %s22_s17 = scalar_lea.vmem %s1315_s1, %s21_s15 }
  0x17   : > { %v42_v0 = vld [vmem:[%s22_s17] sm:$0x1] }
  0x18   : > { %43 = vst [vmem:[%s23_s18] sm:$0x1] %v42_v0 }
  0x19   : > { %68 = vsyncadd %s24_s19, 16  ;;  %s19_s14 = sadd.s32 1, %s1222_s14  }
  0x1a   : > { %p16_p5 = scmp.ge.s32.totalorder %s19_s14, 128  }
  0x1b   :  { %s1224_s20 = smov (%p16_p5), 0  }
  0x1c   :  { %18 = sbr.rel (!%p16_p5) target bundleno = 16 (0x10), region = 205 }
  0x23 LB: > { %s75_s21 = scalar_lea.sflag [#allocation3], %s1226_s20  ;;  %s1226_s20 = sphi %s1224_s20, %s74_s20  }
  0x24   : > { %1218 = dma.done.wait %s75_s21, 16 }
  0x25   : > { %1219 = vsyncadd %s75_s21, 4294967280  ;;  %s74_s20 = sadd.s32 1, %s1226_s20  }
  0x26   : > { %p71_p6 = scmp.ge.s32.totalorder %s74_s20, 128  }
  0x27   :  { %v79_v1 = vld [vmem:[#allocation2] sm:$0xff] (%p71_p6)  ;;  %vm111_vm0 = vcmask (%p71_p6), 261120   ;;  %v80_v2 = vld [vmem:[#allocation2 + $0x8] sm:$0xff] (%p71_p6)  ;;  %v81_v3 = vld [vmem:[#allocation2 + $0x10] sm:$0xff] (%p71_p6) }
  0x28   :  { %73 = sbr.rel (!%p71_p6) target bundleno = 35 (0x23), region = 216  ;;  %v95_v4 = vmul.f32 (%p71_p6), 5.656854, %v79_v1  ;;  %v96_v5 = vmul.f32 (%p71_p6), 5.656854, %v80_v2  ;;  %v82_v7 = vld [vmem:[#allocation2 + $0x18] sm:$0xff] (%p71_p6) }
  0x29   :  { %v97_v6 = vmul.f32 (%p71_p6), 5.656854, %v81_v3  ;;  %v83_v8 = vld [vmem:[#allocation2 + $0x20] sm:$0xff] (%p71_p6)  ;;  %v84_v9 = vld [vmem:[#allocation2 + $0x28] sm:$0xff] (%p71_p6)  ;;  %v98_v10 = vmul.f32 (%p71_p6), 5.656854, %v82_v7 }
  0x2a   :  { %112 = vst.msk [vmem:[%s1316_s2] sm:$0xff] (%p71_p6), %vm111_vm0, %v95_v4  ;;  %113 = vst.msk [vmem:[%s1316_s2 + $0x8] sm:$0xff] (%p71_p6), %vm111_vm0, %v96_v5  ;;  %v99_v11 = vmul.f32 (%p71_p6), 5.656854, %v83_v8  ;;  %v100_v12 = vmul.f32 (%p71_p6), 5.656854, %v84_v9 }
  0x2b   :  { %114 = vst.msk [vmem:[%s1316_s2 + $0x10] sm:$0xff] (%p71_p6), %vm111_vm0, %v97_v6  ;;  %v85_v13 = vld [vmem:[#allocation2 + $0x30] sm:$0xff] (%p71_p6)  ;;  %v86_v14 = vld [vmem:[#allocation2 + $0x38] sm:$0xff] (%p71_p6)  ;;  %v87_v15 = vld [vmem:[#allocation2 + $0x40] sm:$0xff] (%p71_p6) }
  0x2c   :  { %115 = vst.msk [vmem:[%s1316_s2 + $0x18] sm:$0xff] (%p71_p6), %vm111_vm0, %v98_v10  ;;  %116 = vst.msk [vmem:[%s1316_s2 + $0x20] sm:$0xff] (%p71_p6), %vm111_vm0, %v99_v11  ;;  %v101_v16 = vmul.f32 (%p71_p6), 5.656854, %v85_v13  ;;  %v102_v17 = vmul.f32 (%p71_p6), 5.656854, %v86_v14 }
  0x2d   :  { %117 = vst.msk [vmem:[%s1316_s2 + $0x28] sm:$0xff] (%p71_p6), %vm111_vm0, %v100_v12  ;;  %v103_v18 = vmul.f32 (%p71_p6), 5.656854, %v87_v15  ;;  %v88_v19 = vld [vmem:[#allocation2 + $0x48] sm:$0xff] (%p71_p6)  ;;  %v89_v20 = vld [vmem:[#allocation2 + $0x50] sm:$0xff] (%p71_p6)  ;;  %v90_v21 = vld [vmem:[#allocation2 + $0x58] sm:$0xff] (%p71_p6) }
  0x2e   :  { %118 = vst.msk [vmem:[%s1316_s2 + $0x30] sm:$0xff] (%p71_p6), %vm111_vm0, %v101_v16  ;;  %119 = vst.msk [vmem:[%s1316_s2 + $0x38] sm:$0xff] (%p71_p6), %vm111_vm0, %v102_v17  ;;  %v104_v22 = vmul.f32 (%p71_p6), 5.656854, %v88_v19  ;;  %v105_v23 = vmul.f32 (%p71_p6), 5.656854, %v89_v20 }
  0x2f   :  { %120 = vst.msk [vmem:[%s1316_s2 + $0x40] sm:$0xff] %vm111_vm0, %v103_v18  ;;  %v106_v24 = vmul.f32 5.656854, %v90_v21  ;;  %v91_v25 = vld [vmem:[#allocation2 + $0x60] sm:$0xff]  ;;  %v92_v26 = vld [vmem:[#allocation2 + $0x68] sm:$0xff]  ;;  %v93_v27 = vld [vmem:[#allocation2 + $0x70] sm:$0xff] }
  0x30   :  { %121 = vst.msk [vmem:[%s1316_s2 + $0x48] sm:$0xff] %vm111_vm0, %v104_v22  ;;  %122 = vst.msk [vmem:[%s1316_s2 + $0x50] sm:$0xff] %vm111_vm0, %v105_v23  ;;  %v107_v28 = vmul.f32 5.656854, %v91_v25  ;;  %v108_v29 = vmul.f32 5.656854, %v92_v26 }
  0x31   :  { %123 = vst.msk [vmem:[%s1316_s2 + $0x58] sm:$0xff] %vm111_vm0, %v106_v24  ;;  %v109_v30 = vmul.f32 5.656854, %v93_v27  ;;  %v94_v31 = vld [vmem:[#allocation2 + $0x78] sm:$0xff] }
  0x32   :  { %124 = vst.msk [vmem:[%s1316_s2 + $0x60] sm:$0xff] %vm111_vm0, %v107_v28  ;;  %125 = vst.msk [vmem:[%s1316_s2 + $0x68] sm:$0xff] %vm111_vm0, %v108_v29  ;;  %v110_v32 = vmul.f32 5.656854, %v94_v31 }
  0x33   :  { %126 = vst.msk [vmem:[%s1316_s2 + $0x70] sm:$0xff] %vm111_vm0, %v109_v30 }
  0x34   :  { %127 = vst.msk [vmem:[%s1316_s2 + $0x78] sm:$0xff] %vm111_vm0, %v110_v32 }
  0x35   :  { %132 = vsyncmov [#allocation3] }
  0x38   :  { %s133_s23 = vpop.sfrf %132 }
  0x39   :  { %p1051_p7 = scmp.ne.s32.totalorder %s133_s23, 0 }
  0x3b   :  { %137 = shalt.err (%p1051_p7)  }
  0x3c   :  { %139 = vsyncmov [#allocation3 + $0x1] }
  0x3f   :  { %s140_s24 = vpop.sfrf %139 }
  0x40   :  { %p1052_p8 = scmp.ne.s32.totalorder %s140_s24, 0 }
  0x42   :  { %144 = shalt.err (%p1052_p8)  }
  0x43   :  { %146 = vsyncmov [#allocation3 + $0x2] }
  0x46   :  { %s147_s25 = vpop.sfrf %146 }
  0x47   :  { %p1053_p9 = scmp.ne.s32.totalorder %s147_s25, 0 }
  0x49   :  { %151 = shalt.err (%p1053_p9)  }
  0x4a   :  { %153 = vsyncmov [#allocation3 + $0x3] }
  0x4d   :  { %s154_s26 = vpop.sfrf %153 }
  0x4e   :  { %p1054_p10 = scmp.ne.s32.totalorder %s154_s26, 0 }
  0x50   :  { %158 = shalt.err (%p1054_p10)  }
  0x51   :  { %160 = vsyncmov [#allocation3 + $0x4] }
  0x54   :  { %s161_s27 = vpop.sfrf %160 }
  0x55   :  { %p1055_p11 = scmp.ne.s32.totalorder %s161_s27, 0 }
  0x57   :  { %165 = shalt.err (%p1055_p11)  }
  0x58   :  { %167 = vsyncmov [#allocation3 + $0x5] }
  0x5b   :  { %s168_s2 = vpop.sfrf %167 }
  0x5c   :  { %p1056_p12 = scmp.ne.s32.totalorder %s168_s2, 0 }
  0x5e   :  { %172 = shalt.err (%p1056_p12)  }
  0x5f   :  { %174 = vsyncmov [#allocation3 + $0x6] }
  0x62   :  { %s175_s28 = vpop.sfrf %174 }
  0x63   :  { %p1057_p13 = scmp.ne.s32.totalorder %s175_s28, 0 }
  0x65   :  { %179 = shalt.err (%p1057_p13)  }
  0x66   :  { %181 = vsyncmov [#allocation3 + $0x7] }
  0x69   :  { %s182_s29 = vpop.sfrf %181 }
  0x6a   :  { %p1058_p0 = scmp.ne.s32.totalorder %s182_s29, 0 }
  0x6c   :  { %186 = shalt.err (%p1058_p0)  }
  0x6d   :  { %188 = vsyncmov [#allocation3 + $0x8] }
  0x70   :  { %s189_s30 = vpop.sfrf %188 }
  0x71   :  { %p1059_p1 = scmp.ne.s32.totalorder %s189_s30, 0 }
  0x73   :  { %193 = shalt.err (%p1059_p1)  }
  0x74   :  { %195 = vsyncmov [#allocation3 + $0x9] }
  0x77   :  { %s196_s3 = vpop.sfrf %195 }
  0x78   :  { %p1060_p2 = scmp.ne.s32.totalorder %s196_s3, 0 }
  0x7a   :  { %200 = shalt.err (%p1060_p2)  }
  0x7b   :  { %202 = vsyncmov [#allocation3 + $0xa] }
  0x7e   :  { %s203_s4 = vpop.sfrf %202 }
  0x7f   :  { %p1061_p3 = scmp.ne.s32.totalorder %s203_s4, 0 }
  0x81   :  { %207 = shalt.err (%p1061_p3)  }
  0x82   :  { %209 = vsyncmov [#allocation3 + $0xb] }
  0x85   :  { %s210_s5 = vpop.sfrf %209 }
  0x86   :  { %p1062_p4 = scmp.ne.s32.totalorder %s210_s5, 0 }
  0x88   :  { %214 = shalt.err (%p1062_p4)  }
  0x89   :  { %216 = vsyncmov [#allocation3 + $0xc] }
  0x8c   :  { %s217_s6 = vpop.sfrf %216 }
  0x8d   :  { %p1063_p5 = scmp.ne.s32.totalorder %s217_s6, 0 }
  0x8f   :  { %221 = shalt.err (%p1063_p5)  }
  0x90   :  { %223 = vsyncmov [#allocation3 + $0xd] }
  0x93   :  { %s224_s7 = vpop.sfrf %223 }
  0x94   :  { %p1064_p6 = scmp.ne.s32.totalorder %s224_s7, 0 }
  0x96   :  { %228 = shalt.err (%p1064_p6)  }
  0x97   :  { %230 = vsyncmov [#allocation3 + $0xe] }
  0x9a   :  { %s231_s8 = vpop.sfrf %230 }
  0x9b   :  { %p1065_p7 = scmp.ne.s32.totalorder %s231_s8, 0 }
  0x9d   :  { %235 = shalt.err (%p1065_p7)  }
  0x9e   :  { %237 = vsyncmov [#allocation3 + $0xf] }
  0xa1   :  { %s238_s9 = vpop.sfrf %237 }
  0xa2   :  { %p1066_p8 = scmp.ne.s32.totalorder %s238_s9, 0 }
  0xa4   :  { %242 = shalt.err (%p1066_p8)  }
  0xa5   :  { %244 = vsyncmov [#allocation3 + $0x10] }
  0xa8   :  { %s245_s10 = vpop.sfrf %244 }
  0xa9   :  { %p1067_p9 = scmp.ne.s32.totalorder %s245_s10, 0 }
  0xab   :  { %249 = shalt.err (%p1067_p9)  }
  0xac   :  { %251 = vsyncmov [#allocation3 + $0x11] }
  0xaf   :  { %s252_s11 = vpop.sfrf %251 }
  0xb0   :  { %p1068_p10 = scmp.ne.s32.totalorder %s252_s11, 0 }
  0xb2   :  { %256 = shalt.err (%p1068_p10)  }
  0xb3   :  { %258 = vsyncmov [#allocation3 + $0x12] }
  0xb6   :  { %s259_s12 = vpop.sfrf %258 }
  0xb7   :  { %p1069_p11 = scmp.ne.s32.totalorder %s259_s12, 0 }
  0xb9   :  { %263 = shalt.err (%p1069_p11)  }
  0xba   :  { %265 = vsyncmov [#allocation3 + $0x13] }
  0xbd   :  { %s266_s13 = vpop.sfrf %265 }
  0xbe   :  { %p1070_p12 = scmp.ne.s32.totalorder %s266_s13, 0 }
  0xc0   :  { %270 = shalt.err (%p1070_p12)  }
  0xc1   :  { %272 = vsyncmov [#allocation3 + $0x14] }
  0xc4   :  { %s273_s14 = vpop.sfrf %272 }
  0xc5   :  { %p1071_p13 = scmp.ne.s32.totalorder %s273_s14, 0 }
  0xc7   :  { %277 = shalt.err (%p1071_p13)  }
  0xc8   :  { %279 = vsyncmov [#allocation3 + $0x15] }
  0xcb   :  { %s280_s15 = vpop.sfrf %279 }
  0xcc   :  { %p1072_p0 = scmp.ne.s32.totalorder %s280_s15, 0 }
  0xce   :  { %284 = shalt.err (%p1072_p0)  }
  0xcf   :  { %286 = vsyncmov [#allocation3 + $0x16] }
  0xd2   :  { %s287_s16 = vpop.sfrf %286 }
  0xd3   :  { %p1073_p1 = scmp.ne.s32.totalorder %s287_s16, 0 }
  0xd5   :  { %291 = shalt.err (%p1073_p1)  }
  0xd6   :  { %293 = vsyncmov [#allocation3 + $0x17] }
  0xd9   :  { %s294_s0 = vpop.sfrf %293 }
  0xda   :  { %p1074_p2 = scmp.ne.s32.totalorder %s294_s0, 0 }
  0xdc   :  { %298 = shalt.err (%p1074_p2)  }
  0xdd   :  { %300 = vsyncmov [#allocation3 + $0x18] }
  0xe0   :  { %s301_s17 = vpop.sfrf %300 }
  0xe1   :  { %p1075_p3 = scmp.ne.s32.totalorder %s301_s17, 0 }
  0xe3   :  { %305 = shalt.err (%p1075_p3)  }
  0xe4   :  { %307 = vsyncmov [#allocation3 + $0x19] }
  0xe7   :  { %s308_s18 = vpop.sfrf %307 }
  0xe8   :  { %p1076_p4 = scmp.ne.s32.totalorder %s308_s18, 0 }
  0xea   :  { %312 = shalt.err (%p1076_p4)  }
  0xeb   :  { %314 = vsyncmov [#allocation3 + $0x1a] }
  0xee   :  { %s315_s19 = vpop.sfrf %314 }
  0xef   :  { %p1077_p5 = scmp.ne.s32.totalorder %s315_s19, 0 }
  0xf1   :  { %319 = shalt.err (%p1077_p5)  }
  0xf2   :  { %321 = vsyncmov [#allocation3 + $0x1b] }
  0xf5   :  { %s322_s20 = vpop.sfrf %321 }
  0xf6   :  { %p1078_p6 = scmp.ne.s32.totalorder %s322_s20, 0 }
  0xf8   :  { %326 = shalt.err (%p1078_p6)  }
  0xf9   :  { %328 = vsyncmov [#allocation3 + $0x1c] }
  0xfc   :  { %s329_s21 = vpop.sfrf %328 }
  0xfd   :  { %p1079_p7 = scmp.ne.s32.totalorder %s329_s21, 0 }
  0xff   :  { %333 = shalt.err (%p1079_p7)  }
 0x100   :  { %335 = vsyncmov [#allocation3 + $0x1d] }
 0x103   :  { %s336_s1 = vpop.sfrf %335 }
 0x104   :  { %p1080_p8 = scmp.ne.s32.totalorder %s336_s1, 0 }
 0x106   :  { %340 = shalt.err (%p1080_p8)  }
 0x107   :  { %342 = vsyncmov [#allocation3 + $0x1e] }
 0x10a   :  { %s343_s22 = vpop.sfrf %342 }
 0x10b   :  { %p1081_p9 = scmp.ne.s32.totalorder %s343_s22, 0 }
 0x10d   :  { %347 = shalt.err (%p1081_p9)  }
 0x10e   :  { %349 = vsyncmov [#allocation3 + $0x1f] }
 0x111   :  { %s350_s23 = vpop.sfrf %349 }
 0x112   :  { %p1082_p10 = scmp.ne.s32.totalorder %s350_s23, 0 }
 0x114   :  { %354 = shalt.err (%p1082_p10)  }
 0x115   :  { %356 = vsyncmov [#allocation3 + $0x20] }
 0x118   :  { %s357_s24 = vpop.sfrf %356 }
 0x119   :  { %p1083_p11 = scmp.ne.s32.totalorder %s357_s24, 0 }
 0x11b   :  { %361 = shalt.err (%p1083_p11)  }
 0x11c   :  { %363 = vsyncmov [#allocation3 + $0x21] }
 0x11f   :  { %s364_s25 = vpop.sfrf %363 }
 0x120   :  { %p1084_p12 = scmp.ne.s32.totalorder %s364_s25, 0 }
 0x122   :  { %368 = shalt.err (%p1084_p12)  }
 0x123   :  { %370 = vsyncmov [#allocation3 + $0x22] }
 0x126   :  { %s371_s26 = vpop.sfrf %370 }
 0x127   :  { %p1085_p13 = scmp.ne.s32.totalorder %s371_s26, 0 }
 0x129   :  { %375 = shalt.err (%p1085_p13)  }
 0x12a   :  { %377 = vsyncmov [#allocation3 + $0x23] }
 0x12d   :  { %s378_s27 = vpop.sfrf %377 }
 0x12e   :  { %p1086_p0 = scmp.ne.s32.totalorder %s378_s27, 0 }
 0x130   :  { %382 = shalt.err (%p1086_p0)  }
 0x131   :  { %384 = vsyncmov [#allocation3 + $0x24] }
 0x134   :  { %s385_s2 = vpop.sfrf %384 }
 0x135   :  { %p1087_p1 = scmp.ne.s32.totalorder %s385_s2, 0 }
 0x137   :  { %389 = shalt.err (%p1087_p1)  }
 0x138   :  { %391 = vsyncmov [#allocation3 + $0x25] }
 0x13b   :  { %s392_s28 = vpop.sfrf %391 }
 0x13c   :  { %p1088_p2 = scmp.ne.s32.totalorder %s392_s28, 0 }
 0x13e   :  { %396 = shalt.err (%p1088_p2)  }
 0x13f   :  { %398 = vsyncmov [#allocation3 + $0x26] }
 0x142   :  { %s399_s29 = vpop.sfrf %398 }
 0x143   :  { %p1089_p3 = scmp.ne.s32.totalorder %s399_s29, 0 }
 0x145   :  { %403 = shalt.err (%p1089_p3)  }
 0x146   :  { %405 = vsyncmov [#allocation3 + $0x27] }
 0x149   :  { %s406_s30 = vpop.sfrf %405 }
 0x14a   :  { %p1090_p4 = scmp.ne.s32.totalorder %s406_s30, 0 }
 0x14c   :  { %410 = shalt.err (%p1090_p4)  }
 0x14d   :  { %412 = vsyncmov [#allocation3 + $0x28] }
 0x150   :  { %s413_s3 = vpop.sfrf %412 }
 0x151   :  { %p1091_p5 = scmp.ne.s32.totalorder %s413_s3, 0 }
 0x153   :  { %417 = shalt.err (%p1091_p5)  }
 0x154   :  { %419 = vsyncmov [#allocation3 + $0x29] }
 0x157   :  { %s420_s4 = vpop.sfrf %419 }
 0x158   :  { %p1092_p6 = scmp.ne.s32.totalorder %s420_s4, 0 }
 0x15a   :  { %424 = shalt.err (%p1092_p6)  }
 0x15b   :  { %426 = vsyncmov [#allocation3 + $0x2a] }
 0x15e   :  { %s427_s5 = vpop.sfrf %426 }
 0x15f   :  { %p1093_p7 = scmp.ne.s32.totalorder %s427_s5, 0 }
 0x161   :  { %431 = shalt.err (%p1093_p7)  }
 0x162   :  { %433 = vsyncmov [#allocation3 + $0x2b] }
 0x165   :  { %s434_s6 = vpop.sfrf %433 }
 0x166   :  { %p1094_p8 = scmp.ne.s32.totalorder %s434_s6, 0 }
 0x168   :  { %438 = shalt.err (%p1094_p8)  }
 0x169   :  { %440 = vsyncmov [#allocation3 + $0x2c] }
 0x16c   :  { %s441_s7 = vpop.sfrf %440 }
 0x16d   :  { %p1095_p9 = scmp.ne.s32.totalorder %s441_s7, 0 }
 0x16f   :  { %445 = shalt.err (%p1095_p9)  }
 0x170   :  { %447 = vsyncmov [#allocation3 + $0x2d] }
 0x173   :  { %s448_s8 = vpop.sfrf %447 }
 0x174   :  { %p1096_p10 = scmp.ne.s32.totalorder %s448_s8, 0 }
 0x176   :  { %452 = shalt.err (%p1096_p10)  }
 0x177   :  { %454 = vsyncmov [#allocation3 + $0x2e] }
 0x17a   :  { %s455_s9 = vpop.sfrf %454 }
 0x17b   :  { %p1097_p11 = scmp.ne.s32.totalorder %s455_s9, 0 }
 0x17d   :  { %459 = shalt.err (%p1097_p11)  }
 0x17e   :  { %461 = vsyncmov [#allocation3 + $0x2f] }
 0x181   :  { %s462_s10 = vpop.sfrf %461 }
 0x182   :  { %p1098_p12 = scmp.ne.s32.totalorder %s462_s10, 0 }
 0x184   :  { %466 = shalt.err (%p1098_p12)  }
 0x185   :  { %468 = vsyncmov [#allocation3 + $0x30] }
 0x188   :  { %s469_s11 = vpop.sfrf %468 }
 0x189   :  { %p1099_p13 = scmp.ne.s32.totalorder %s469_s11, 0 }
 0x18b   :  { %473 = shalt.err (%p1099_p13)  }
 0x18c   :  { %475 = vsyncmov [#allocation3 + $0x31] }
 0x18f   :  { %s476_s12 = vpop.sfrf %475 }
 0x190   :  { %p1100_p0 = scmp.ne.s32.totalorder %s476_s12, 0 }
 0x192   :  { %480 = shalt.err (%p1100_p0)  }
 0x193   :  { %482 = vsyncmov [#allocation3 + $0x32] }
 0x196   :  { %s483_s13 = vpop.sfrf %482 }
 0x197   :  { %p1101_p1 = scmp.ne.s32.totalorder %s483_s13, 0 }
 0x199   :  { %487 = shalt.err (%p1101_p1)  }
 0x19a   :  { %489 = vsyncmov [#allocation3 + $0x33] }
 0x19d   :  { %s490_s14 = vpop.sfrf %489 }
 0x19e   :  { %p1102_p2 = scmp.ne.s32.totalorder %s490_s14, 0 }
 0x1a0   :  { %494 = shalt.err (%p1102_p2)  }
 0x1a1   :  { %496 = vsyncmov [#allocation3 + $0x34] }
 0x1a4   :  { %s497_s15 = vpop.sfrf %496 }
 0x1a5   :  { %p1103_p3 = scmp.ne.s32.totalorder %s497_s15, 0 }
 0x1a7   :  { %501 = shalt.err (%p1103_p3)  }
 0x1a8   :  { %503 = vsyncmov [#allocation3 + $0x35] }
 0x1ab   :  { %s504_s16 = vpop.sfrf %503 }
 0x1ac   :  { %p1104_p4 = scmp.ne.s32.totalorder %s504_s16, 0 }
 0x1ae   :  { %508 = shalt.err (%p1104_p4)  }
 0x1af   :  { %510 = vsyncmov [#allocation3 + $0x36] }
 0x1b2   :  { %s511_s0 = vpop.sfrf %510 }
 0x1b3   :  { %p1105_p5 = scmp.ne.s32.totalorder %s511_s0, 0 }
 0x1b5   :  { %515 = shalt.err (%p1105_p5)  }
 0x1b6   :  { %517 = vsyncmov [#allocation3 + $0x37] }
 0x1b9   :  { %s518_s17 = vpop.sfrf %517 }
 0x1ba   :  { %p1106_p6 = scmp.ne.s32.totalorder %s518_s17, 0 }
 0x1bc   :  { %522 = shalt.err (%p1106_p6)  }
 0x1bd   :  { %524 = vsyncmov [#allocation3 + $0x38] }
 0x1c0   :  { %s525_s18 = vpop.sfrf %524 }
 0x1c1   :  { %p1107_p7 = scmp.ne.s32.totalorder %s525_s18, 0 }
 0x1c3   :  { %529 = shalt.err (%p1107_p7)  }
 0x1c4   :  { %531 = vsyncmov [#allocation3 + $0x39] }
 0x1c7   :  { %s532_s19 = vpop.sfrf %531 }
 0x1c8   :  { %p1108_p8 = scmp.ne.s32.totalorder %s532_s19, 0 }
 0x1ca   :  { %536 = shalt.err (%p1108_p8)  }
 0x1cb   :  { %538 = vsyncmov [#allocation3 + $0x3a] }
 0x1ce   :  { %s539_s20 = vpop.sfrf %538 }
 0x1cf   :  { %p1109_p9 = scmp.ne.s32.totalorder %s539_s20, 0 }
 0x1d1   :  { %543 = shalt.err (%p1109_p9)  }
 0x1d2   :  { %545 = vsyncmov [#allocation3 + $0x3b] }
 0x1d5   :  { %s546_s21 = vpop.sfrf %545 }
 0x1d6   :  { %p1110_p10 = scmp.ne.s32.totalorder %s546_s21, 0 }
 0x1d8   :  { %550 = shalt.err (%p1110_p10)  }
 0x1d9   :  { %552 = vsyncmov [#allocation3 + $0x3c] }
 0x1dc   :  { %s553_s1 = vpop.sfrf %552 }
 0x1dd   :  { %p1111_p11 = scmp.ne.s32.totalorder %s553_s1, 0 }
 0x1df   :  { %557 = shalt.err (%p1111_p11)  }
 0x1e0   :  { %559 = vsyncmov [#allocation3 + $0x3d] }
 0x1e3   :  { %s560_s22 = vpop.sfrf %559 }
 0x1e4   :  { %p1112_p12 = scmp.ne.s32.totalorder %s560_s22, 0 }
 0x1e6   :  { %564 = shalt.err (%p1112_p12)  }
 0x1e7   :  { %566 = vsyncmov [#allocation3 + $0x3e] }
 0x1ea   :  { %s567_s23 = vpop.sfrf %566 }
 0x1eb   :  { %p1113_p13 = scmp.ne.s32.totalorder %s567_s23, 0 }
 0x1ed   :  { %571 = shalt.err (%p1113_p13)  }
 0x1ee   :  { %573 = vsyncmov [#allocation3 + $0x3f] }
 0x1f1   :  { %s574_s24 = vpop.sfrf %573 }
 0x1f2   :  { %p1114_p0 = scmp.ne.s32.totalorder %s574_s24, 0 }
 0x1f4   :  { %578 = shalt.err (%p1114_p0)  }
 0x1f5   :  { %580 = vsyncmov [#allocation3 + $0x40] }
 0x1f8   :  { %s581_s25 = vpop.sfrf %580 }
 0x1f9   :  { %p1115_p1 = scmp.ne.s32.totalorder %s581_s25, 0 }
 0x1fb   :  { %585 = shalt.err (%p1115_p1)  }
 0x1fc   :  { %587 = vsyncmov [#allocation3 + $0x41] }
 0x1ff   :  { %s588_s26 = vpop.sfrf %587 }
 0x200   :  { %p1116_p2 = scmp.ne.s32.totalorder %s588_s26, 0 }
 0x202   :  { %592 = shalt.err (%p1116_p2)  }
 0x203   :  { %594 = vsyncmov [#allocation3 + $0x42] }
 0x206   :  { %s595_s27 = vpop.sfrf %594 }
 0x207   :  { %p1117_p3 = scmp.ne.s32.totalorder %s595_s27, 0 }
 0x209   :  { %599 = shalt.err (%p1117_p3)  }
 0x20a   :  { %601 = vsyncmov [#allocation3 + $0x43] }
 0x20d   :  { %s602_s2 = vpop.sfrf %601 }
 0x20e   :  { %p1118_p4 = scmp.ne.s32.totalorder %s602_s2, 0 }
 0x210   :  { %606 = shalt.err (%p1118_p4)  }
 0x211   :  { %608 = vsyncmov [#allocation3 + $0x44] }
 0x214   :  { %s609_s28 = vpop.sfrf %608 }
 0x215   :  { %p1119_p5 = scmp.ne.s32.totalorder %s609_s28, 0 }
 0x217   :  { %613 = shalt.err (%p1119_p5)  }
 0x218   :  { %615 = vsyncmov [#allocation3 + $0x45] }
 0x21b   :  { %s616_s29 = vpop.sfrf %615 }
 0x21c   :  { %p1120_p6 = scmp.ne.s32.totalorder %s616_s29, 0 }
 0x21e   :  { %620 = shalt.err (%p1120_p6)  }
 0x21f   :  { %622 = vsyncmov [#allocation3 + $0x46] }
 0x222   :  { %s623_s30 = vpop.sfrf %622 }
 0x223   :  { %p1121_p7 = scmp.ne.s32.totalorder %s623_s30, 0 }
 0x225   :  { %627 = shalt.err (%p1121_p7)  }
 0x226   :  { %629 = vsyncmov [#allocation3 + $0x47] }
 0x229   :  { %s630_s3 = vpop.sfrf %629 }
 0x22a   :  { %p1122_p8 = scmp.ne.s32.totalorder %s630_s3, 0 }
 0x22c   :  { %634 = shalt.err (%p1122_p8)  }
 0x22d   :  { %636 = vsyncmov [#allocation3 + $0x48] }
 0x230   :  { %s637_s4 = vpop.sfrf %636 }
 0x231   :  { %p1123_p9 = scmp.ne.s32.totalorder %s637_s4, 0 }
 0x233   :  { %641 = shalt.err (%p1123_p9)  }
 0x234   :  { %643 = vsyncmov [#allocation3 + $0x49] }
 0x237   :  { %s644_s5 = vpop.sfrf %643 }
 0x238   :  { %p1124_p10 = scmp.ne.s32.totalorder %s644_s5, 0 }
 0x23a   :  { %648 = shalt.err (%p1124_p10)  }
 0x23b   :  { %650 = vsyncmov [#allocation3 + $0x4a] }
 0x23e   :  { %s651_s6 = vpop.sfrf %650 }
 0x23f   :  { %p1125_p11 = scmp.ne.s32.totalorder %s651_s6, 0 }
 0x241   :  { %655 = shalt.err (%p1125_p11)  }
 0x242   :  { %657 = vsyncmov [#allocation3 + $0x4b] }
 0x245   :  { %s658_s7 = vpop.sfrf %657 }
 0x246   :  { %p1126_p12 = scmp.ne.s32.totalorder %s658_s7, 0 }
 0x248   :  { %662 = shalt.err (%p1126_p12)  }
 0x249   :  { %664 = vsyncmov [#allocation3 + $0x4c] }
 0x24c   :  { %s665_s8 = vpop.sfrf %664 }
 0x24d   :  { %p1127_p13 = scmp.ne.s32.totalorder %s665_s8, 0 }
 0x24f   :  { %669 = shalt.err (%p1127_p13)  }
 0x250   :  { %671 = vsyncmov [#allocation3 + $0x4d] }
 0x253   :  { %s672_s9 = vpop.sfrf %671 }
 0x254   :  { %p1128_p0 = scmp.ne.s32.totalorder %s672_s9, 0 }
 0x256   :  { %676 = shalt.err (%p1128_p0)  }
 0x257   :  { %678 = vsyncmov [#allocation3 + $0x4e] }
 0x25a   :  { %s679_s10 = vpop.sfrf %678 }
 0x25b   :  { %p1129_p1 = scmp.ne.s32.totalorder %s679_s10, 0 }
 0x25d   :  { %683 = shalt.err (%p1129_p1)  }
 0x25e   :  { %685 = vsyncmov [#allocation3 + $0x4f] }
 0x261   :  { %s686_s11 = vpop.sfrf %685 }
 0x262   :  { %p1130_p2 = scmp.ne.s32.totalorder %s686_s11, 0 }
 0x264   :  { %690 = shalt.err (%p1130_p2)  }
 0x265   :  { %692 = vsyncmov [#allocation3 + $0x50] }
 0x268   :  { %s693_s12 = vpop.sfrf %692 }
 0x269   :  { %p1131_p3 = scmp.ne.s32.totalorder %s693_s12, 0 }
 0x26b   :  { %697 = shalt.err (%p1131_p3)  }
 0x26c   :  { %699 = vsyncmov [#allocation3 + $0x51] }
 0x26f   :  { %s700_s13 = vpop.sfrf %699 }
 0x270   :  { %p1132_p4 = scmp.ne.s32.totalorder %s700_s13, 0 }
 0x272   :  { %704 = shalt.err (%p1132_p4)  }
 0x273   :  { %706 = vsyncmov [#allocation3 + $0x52] }
 0x276   :  { %s707_s14 = vpop.sfrf %706 }
 0x277   :  { %p1133_p5 = scmp.ne.s32.totalorder %s707_s14, 0 }
 0x279   :  { %711 = shalt.err (%p1133_p5)  }
 0x27a   :  { %713 = vsyncmov [#allocation3 + $0x53] }
 0x27d   :  { %s714_s15 = vpop.sfrf %713 }
 0x27e   :  { %p1134_p6 = scmp.ne.s32.totalorder %s714_s15, 0 }
 0x280   :  { %718 = shalt.err (%p1134_p6)  }
 0x281   :  { %720 = vsyncmov [#allocation3 + $0x54] }
 0x284   :  { %s721_s16 = vpop.sfrf %720 }
 0x285   :  { %p1135_p7 = scmp.ne.s32.totalorder %s721_s16, 0 }
 0x287   :  { %725 = shalt.err (%p1135_p7)  }
 0x288   :  { %727 = vsyncmov [#allocation3 + $0x55] }
 0x28b   :  { %s728_s0 = vpop.sfrf %727 }
 0x28c   :  { %p1136_p8 = scmp.ne.s32.totalorder %s728_s0, 0 }
 0x28e   :  { %732 = shalt.err (%p1136_p8)  }
 0x28f   :  { %734 = vsyncmov [#allocation3 + $0x56] }
 0x292   :  { %s735_s17 = vpop.sfrf %734 }
 0x293   :  { %p1137_p9 = scmp.ne.s32.totalorder %s735_s17, 0 }
 0x295   :  { %739 = shalt.err (%p1137_p9)  }
 0x296   :  { %741 = vsyncmov [#allocation3 + $0x57] }
 0x299   :  { %s742_s18 = vpop.sfrf %741 }
 0x29a   :  { %p1138_p10 = scmp.ne.s32.totalorder %s742_s18, 0 }
 0x29c   :  { %746 = shalt.err (%p1138_p10)  }
 0x29d   :  { %748 = vsyncmov [#allocation3 + $0x58] }
 0x2a0   :  { %s749_s19 = vpop.sfrf %748 }
 0x2a1   :  { %p1139_p11 = scmp.ne.s32.totalorder %s749_s19, 0 }
 0x2a3   :  { %753 = shalt.err (%p1139_p11)  }
 0x2a4   :  { %755 = vsyncmov [#allocation3 + $0x59] }
 0x2a7   :  { %s756_s20 = vpop.sfrf %755 }
 0x2a8   :  { %p1140_p12 = scmp.ne.s32.totalorder %s756_s20, 0 }
 0x2aa   :  { %760 = shalt.err (%p1140_p12)  }
 0x2ab   :  { %762 = vsyncmov [#allocation3 + $0x5a] }
 0x2ae   :  { %s763_s21 = vpop.sfrf %762 }
 0x2af   :  { %p1141_p13 = scmp.ne.s32.totalorder %s763_s21, 0 }
 0x2b1   :  { %767 = shalt.err (%p1141_p13)  }
 0x2b2   :  { %769 = vsyncmov [#allocation3 + $0x5b] }
 0x2b5   :  { %s770_s1 = vpop.sfrf %769 }
 0x2b6   :  { %p1142_p0 = scmp.ne.s32.totalorder %s770_s1, 0 }
 0x2b8   :  { %774 = shalt.err (%p1142_p0)  }
 0x2b9   :  { %776 = vsyncmov [#allocation3 + $0x5c] }
 0x2bc   :  { %s777_s22 = vpop.sfrf %776 }
 0x2bd   :  { %p1143_p1 = scmp.ne.s32.totalorder %s777_s22, 0 }
 0x2bf   :  { %781 = shalt.err (%p1143_p1)  }
 0x2c0   :  { %783 = vsyncmov [#allocation3 + $0x5d] }
 0x2c3   :  { %s784_s23 = vpop.sfrf %783 }
 0x2c4   :  { %p1144_p2 = scmp.ne.s32.totalorder %s784_s23, 0 }
 0x2c6   :  { %788 = shalt.err (%p1144_p2)  }
 0x2c7   :  { %790 = vsyncmov [#allocation3 + $0x5e] }
 0x2ca   :  { %s791_s24 = vpop.sfrf %790 }
 0x2cb   :  { %p1145_p3 = scmp.ne.s32.totalorder %s791_s24, 0 }
 0x2cd   :  { %795 = shalt.err (%p1145_p3)  }
 0x2ce   :  { %797 = vsyncmov [#allocation3 + $0x5f] }
 0x2d1   :  { %s798_s25 = vpop.sfrf %797 }
 0x2d2   :  { %p1146_p4 = scmp.ne.s32.totalorder %s798_s25, 0 }
 0x2d4   :  { %802 = shalt.err (%p1146_p4)  }
 0x2d5   :  { %804 = vsyncmov [#allocation3 + $0x60] }
 0x2d8   :  { %s805_s26 = vpop.sfrf %804 }
 0x2d9   :  { %p1147_p5 = scmp.ne.s32.totalorder %s805_s26, 0 }
 0x2db   :  { %809 = shalt.err (%p1147_p5)  }
 0x2dc   :  { %811 = vsyncmov [#allocation3 + $0x61] }
 0x2df   :  { %s812_s27 = vpop.sfrf %811 }
 0x2e0   :  { %p1148_p6 = scmp.ne.s32.totalorder %s812_s27, 0 }
 0x2e2   :  { %816 = shalt.err (%p1148_p6)  }
 0x2e3   :  { %818 = vsyncmov [#allocation3 + $0x62] }
 0x2e6   :  { %s819_s2 = vpop.sfrf %818 }
 0x2e7   :  { %p1149_p7 = scmp.ne.s32.totalorder %s819_s2, 0 }
 0x2e9   :  { %823 = shalt.err (%p1149_p7)  }
 0x2ea   :  { %825 = vsyncmov [#allocation3 + $0x63] }
 0x2ed   :  { %s826_s28 = vpop.sfrf %825 }
 0x2ee   :  { %p1150_p8 = scmp.ne.s32.totalorder %s826_s28, 0 }
 0x2f0   :  { %830 = shalt.err (%p1150_p8)  }
 0x2f1   :  { %832 = vsyncmov [#allocation3 + $0x64] }
 0x2f4   :  { %s833_s29 = vpop.sfrf %832 }
 0x2f5   :  { %p1151_p9 = scmp.ne.s32.totalorder %s833_s29, 0 }
 0x2f7   :  { %837 = shalt.err (%p1151_p9)  }
 0x2f8   :  { %839 = vsyncmov [#allocation3 + $0x65] }
 0x2fb   :  { %s840_s30 = vpop.sfrf %839 }
 0x2fc   :  { %p1152_p10 = scmp.ne.s32.totalorder %s840_s30, 0 }
 0x2fe   :  { %844 = shalt.err (%p1152_p10)  }
 0x2ff   :  { %846 = vsyncmov [#allocation3 + $0x66] }
 0x302   :  { %s847_s3 = vpop.sfrf %846 }
 0x303   :  { %p1153_p11 = scmp.ne.s32.totalorder %s847_s3, 0 }
 0x305   :  { %851 = shalt.err (%p1153_p11)  }
 0x306   :  { %853 = vsyncmov [#allocation3 + $0x67] }
 0x309   :  { %s854_s4 = vpop.sfrf %853 }
 0x30a   :  { %p1154_p12 = scmp.ne.s32.totalorder %s854_s4, 0 }
 0x30c   :  { %858 = shalt.err (%p1154_p12)  }
 0x30d   :  { %860 = vsyncmov [#allocation3 + $0x68] }
 0x310   :  { %s861_s5 = vpop.sfrf %860 }
 0x311   :  { %p1155_p13 = scmp.ne.s32.totalorder %s861_s5, 0 }
 0x313   :  { %865 = shalt.err (%p1155_p13)  }
 0x314   :  { %867 = vsyncmov [#allocation3 + $0x69] }
 0x317   :  { %s868_s6 = vpop.sfrf %867 }
 0x318   :  { %p1156_p0 = scmp.ne.s32.totalorder %s868_s6, 0 }
 0x31a   :  { %872 = shalt.err (%p1156_p0)  }
 0x31b   :  { %874 = vsyncmov [#allocation3 + $0x6a] }
 0x31e   :  { %s875_s7 = vpop.sfrf %874 }
 0x31f   :  { %p1157_p1 = scmp.ne.s32.totalorder %s875_s7, 0 }
 0x321   :  { %879 = shalt.err (%p1157_p1)  }
 0x322   :  { %881 = vsyncmov [#allocation3 + $0x6b] }
 0x325   :  { %s882_s8 = vpop.sfrf %881 }
 0x326   :  { %p1158_p2 = scmp.ne.s32.totalorder %s882_s8, 0 }
 0x328   :  { %886 = shalt.err (%p1158_p2)  }
 0x329   :  { %888 = vsyncmov [#allocation3 + $0x6c] }
 0x32c   :  { %s889_s9 = vpop.sfrf %888 }
 0x32d   :  { %p1159_p3 = scmp.ne.s32.totalorder %s889_s9, 0 }
 0x32f   :  { %893 = shalt.err (%p1159_p3)  }
 0x330   :  { %895 = vsyncmov [#allocation3 + $0x6d] }
 0x333   :  { %s896_s10 = vpop.sfrf %895 }
 0x334   :  { %p1160_p4 = scmp.ne.s32.totalorder %s896_s10, 0 }
 0x336   :  { %900 = shalt.err (%p1160_p4)  }
 0x337   :  { %902 = vsyncmov [#allocation3 + $0x6e] }
 0x33a   :  { %s903_s11 = vpop.sfrf %902 }
 0x33b   :  { %p1161_p5 = scmp.ne.s32.totalorder %s903_s11, 0 }
 0x33d   :  { %907 = shalt.err (%p1161_p5)  }
 0x33e   :  { %909 = vsyncmov [#allocation3 + $0x6f] }
 0x341   :  { %s910_s12 = vpop.sfrf %909 }
 0x342   :  { %p1162_p6 = scmp.ne.s32.totalorder %s910_s12, 0 }
 0x344   :  { %914 = shalt.err (%p1162_p6)  }
 0x345   :  { %916 = vsyncmov [#allocation3 + $0x70] }
 0x348   :  { %s917_s13 = vpop.sfrf %916 }
 0x349   :  { %p1163_p7 = scmp.ne.s32.totalorder %s917_s13, 0 }
 0x34b   :  { %921 = shalt.err (%p1163_p7)  }
 0x34c   :  { %923 = vsyncmov [#allocation3 + $0x71] }
 0x34f   :  { %s924_s14 = vpop.sfrf %923 }
 0x350   :  { %p1164_p8 = scmp.ne.s32.totalorder %s924_s14, 0 }
 0x352   :  { %928 = shalt.err (%p1164_p8)  }
 0x353   :  { %930 = vsyncmov [#allocation3 + $0x72] }
 0x356   :  { %s931_s15 = vpop.sfrf %930 }
 0x357   :  { %p1165_p9 = scmp.ne.s32.totalorder %s931_s15, 0 }
 0x359   :  { %935 = shalt.err (%p1165_p9)  }
 0x35a   :  { %937 = vsyncmov [#allocation3 + $0x73] }
 0x35d   :  { %s938_s16 = vpop.sfrf %937 }
 0x35e   :  { %p1166_p10 = scmp.ne.s32.totalorder %s938_s16, 0 }
 0x360   :  { %942 = shalt.err (%p1166_p10)  }
 0x361   :  { %944 = vsyncmov [#allocation3 + $0x74] }
 0x364   :  { %s945_s0 = vpop.sfrf %944 }
 0x365   :  { %p1167_p11 = scmp.ne.s32.totalorder %s945_s0, 0 }
 0x367   :  { %949 = shalt.err (%p1167_p11)  }
 0x368   :  { %951 = vsyncmov [#allocation3 + $0x75] }
 0x36b   :  { %s952_s17 = vpop.sfrf %951 }
 0x36c   :  { %p1168_p12 = scmp.ne.s32.totalorder %s952_s17, 0 }
 0x36e   :  { %956 = shalt.err (%p1168_p12)  }
 0x36f   :  { %958 = vsyncmov [#allocation3 + $0x76] }
 0x372   :  { %s959_s18 = vpop.sfrf %958 }
 0x373   :  { %p1169_p13 = scmp.ne.s32.totalorder %s959_s18, 0 }
 0x375   :  { %963 = shalt.err (%p1169_p13)  }
 0x376   :  { %965 = vsyncmov [#allocation3 + $0x77] }
 0x379   :  { %s966_s19 = vpop.sfrf %965 }
 0x37a   :  { %p1170_p0 = scmp.ne.s32.totalorder %s966_s19, 0 }
 0x37c   :  { %970 = shalt.err (%p1170_p0)  }
 0x37d   :  { %972 = vsyncmov [#allocation3 + $0x78] }
 0x380   :  { %s973_s20 = vpop.sfrf %972 }
 0x381   :  { %p1171_p1 = scmp.ne.s32.totalorder %s973_s20, 0 }
 0x383   :  { %977 = shalt.err (%p1171_p1)  }
 0x384   :  { %979 = vsyncmov [#allocation3 + $0x79] }
 0x387   :  { %s980_s21 = vpop.sfrf %979 }
 0x388   :  { %p1172_p2 = scmp.ne.s32.totalorder %s980_s21, 0 }
 0x38a   :  { %984 = shalt.err (%p1172_p2)  }
 0x38b   :  { %986 = vsyncmov [#allocation3 + $0x7a] }
 0x38e   :  { %s987_s1 = vpop.sfrf %986 }
 0x38f   :  { %p1173_p3 = scmp.ne.s32.totalorder %s987_s1, 0 }
 0x391   :  { %991 = shalt.err (%p1173_p3)  }
 0x392   :  { %993 = vsyncmov [#allocation3 + $0x7b] }
 0x395   :  { %s994_s22 = vpop.sfrf %993 }
 0x396   :  { %p1174_p4 = scmp.ne.s32.totalorder %s994_s22, 0 }
 0x398   :  { %998 = shalt.err (%p1174_p4)  }
 0x399   :  { %1000 = vsyncmov [#allocation3 + $0x7c] }
 0x39c   :  { %s1001_s23 = vpop.sfrf %1000 }
 0x39d   :  { %p1175_p5 = scmp.ne.s32.totalorder %s1001_s23, 0 }
 0x39f   :  { %1005 = shalt.err (%p1175_p5)  }
 0x3a0   :  { %1007 = vsyncmov [#allocation3 + $0x7d] }
 0x3a3   :  { %s1008_s24 = vpop.sfrf %1007 }
 0x3a4   :  { %p1176_p6 = scmp.ne.s32.totalorder %s1008_s24, 0 }
 0x3a6   :  { %1012 = shalt.err (%p1176_p6)  }
 0x3a7   :  { %1014 = vsyncmov [#allocation3 + $0x7e] }
 0x3aa   :  { %s1015_s25 = vpop.sfrf %1014 }
 0x3ab   :  { %p1177_p7 = scmp.ne.s32.totalorder %s1015_s25, 0 }
 0x3ad   :  { %1019 = shalt.err (%p1177_p7)  }
 0x3ae   :  { %1021 = vsyncmov [#allocation3 + $0x7f] }
 0x3b1   :  { %s1022_s26 = vpop.sfrf %1021 }
 0x3b2   :  { %p1178_p8 = scmp.ne.s32.totalorder %s1022_s26, 0 }
 0x3b4   :  { %1026 = shalt.err (%p1178_p8)  }

</bundles_post_ra>
